<compile_context>
chip_gen: v7x
topology: tpu7x:2x2x1
jax: 0.10.0
libtpu: 0.0.40
codegen_flags: <defaults>
</compile_context>

<pallas_src>
import jax
import jax.numpy as jnp
from jax.experimental import pallas as pl
from jax.experimental.pallas import tpu as pltpu


def _round_up(x, m):
    return ((x + m - 1) // m) * m


def _vmem_capacity_bytes():
    """Physical VMEM per core; conservative 64 MiB (v7x) fallback."""
    try:
        return int(pltpu.get_tpu_info().vmem_capacity_bytes)
    except Exception:
        return 64 * 1024 * 1024


def _ffn_kernel(x_ref, w1_ref, b1_ref, w2_ref, b2_ref, o_ref, acc_ref):
    # x_ref : (tm, Dp) bf16      w1_ref: (Dp, tf) bf16   b1_ref: (1, tf) f32
    # w2_ref: (tf, Dp) bf16      b2_ref: (1, Dp) f32
    # o_ref : (tm, Dp) bf16      acc_ref: (tm, Dp) f32 scratch
    k = pl.program_id(1)

    @pl.when(k == 0)
    def _():
        acc_ref[...] = jnp.zeros_like(acc_ref)

    # fc1 chunk (MXU, bf16 operands, f32 accumulate) + bias + ReLU.
    h = jnp.dot(x_ref[...], w1_ref[...], preferred_element_type=jnp.float32)
    h = jnp.maximum(h + b1_ref[...], 0.0)

    # fc2 partial: accumulate over the d_ff chunks in f32.
    acc_ref[...] += jnp.dot(h.astype(jnp.bfloat16), w2_ref[...],
                            preferred_element_type=jnp.float32)

    @pl.when(k == pl.num_programs(1) - 1)
    def _():
        # b2 added exactly once, at finalize.
        o_ref[...] = (acc_ref[...] + b2_ref[...]).astype(o_ref.dtype)


def prepare_ffn_params(w1, b1, w2, b2, *, tf=None):
    """One-time prep: pad to lane-aligned shapes and cast weights to bf16.

    Call once (outside the per-forward path) and reuse the result.
    w1: (d_model, d_ff), b1: (d_ff,), w2: (d_ff, d_model), b2: (d_model,).
    """
    D, F = w1.shape
    assert w2.shape == (F, D) and b1.shape == (F,) and b2.shape == (D,)

    Dp = _round_up(D, 128)                       # lane-dense output / MXU width
    if tf is None:
        tf = min(512, _round_up(F, 128))         # d_ff chunk size
    tf = _round_up(tf, 128)
    Fp = _round_up(F, tf)

    w1p = jnp.pad(w1.astype(jnp.bfloat16), ((0, Dp - D), (0, Fp - F)))
    w2p = jnp.pad(w2.astype(jnp.bfloat16), ((0, Fp - F), (0, Dp - D)))
    b1p = jnp.pad(b1.astype(jnp.float32), (0, Fp - F)).reshape(1, Fp)
    b2p = jnp.pad(b2.astype(jnp.float32), (0, Dp - D)).reshape(1, Dp)
    return dict(w1=w1p, b1=b1p, w2=w2p, b2=b2p,
                d_model=D, d_ff=F, d_model_pad=Dp, d_ff_pad=Fp, tf=tf)


def positionwise_ffn(x, params, *, tm=None):
    """x: (..., d_model) (any float dtype; streamed as bf16).  Returns bf16."""
    D = params["d_model"]
    Dp = params["d_model_pad"]
    Fp = params["d_ff_pad"]
    tf = params["tf"]
    assert x.shape[-1] == D

    orig_shape = x.shape
    x2d = x.reshape(-1, D).astype(jnp.bfloat16)
    N = x2d.shape[0]

    vmem_cap = _vmem_capacity_bytes()
    if tm is None:
        # Larger row tiles on 128-MiB-VMEM chips (v5e/v6e); 256 on v7x (64 MiB).
        tm = 512 if vmem_cap >= (100 << 20) else 256
    tm = max(8, min(tm, _round_up(N, 8)))

    n_pad_rows = (-N) % tm
    if n_pad_rows or Dp != D:
        x2d = jnp.pad(x2d, ((0, n_pad_rows), (0, Dp - D)))
    n_rows = N + n_pad_rows
    grid = (n_rows // tm, Fp // tf)

    # VMEM footprint estimate (bf16 activations/weights, f32 acc + h), with
    # headroom; capped at ~75% of this generation's physical VMEM.
    vmem_est = (
        2 * tm * Dp * 2          # x tile, bf16, double-buffered
        + 2 * Dp * tf * 2        # w1 chunk, bf16, double-buffered
        + 2 * tf * Dp * 2        # w2 chunk, bf16, double-buffered
        + 2 * tf * 4 + Dp * 4    # b1 (x2) + b2 (single-buffered)
        + 2 * tm * Dp * 2        # out tile, bf16, double-buffered
        + tm * Dp * 4            # f32 accumulator scratch
        + tm * tf * 4            # f32 intermediate h
    )
    vmem_limit = int(min(max(int(1.5 * vmem_est), 16 << 20),
                         int(0.75 * vmem_cap)))

    out = pl.pallas_call(
        _ffn_kernel,
        out_shape=jax.ShapeDtypeStruct((n_rows, Dp), jnp.bfloat16),
        grid_spec=pltpu.PrefetchScalarGridSpec(
            num_scalar_prefetch=0,
            grid=grid,
            in_specs=[
                pl.BlockSpec((tm, Dp), lambda i, k: (i, 0)),   # x row tile
                pl.BlockSpec((Dp, tf), lambda i, k: (0, k)),   # w1 F-chunk
                pl.BlockSpec((1, tf), lambda i, k: (0, k)),    # b1 F-chunk
                pl.BlockSpec((tf, Dp), lambda i, k: (k, 0)),   # w2 F-chunk
                pl.BlockSpec((1, Dp), lambda i, k: (0, 0),     # b2 (invariant)
                             pipeline_mode=pl.Buffered(1)),
            ],
            out_specs=pl.BlockSpec((tm, Dp), lambda i, k: (i, 0)),
            scratch_shapes=[pltpu.VMEM((tm, Dp), jnp.float32)],
        ),
        compiler_params=pltpu.CompilerParams(
            dimension_semantics=("parallel", "arbitrary"),
            vmem_limit_bytes=vmem_limit,
        ),
    )(x2d, params["w1"], params["b1"], params["w2"], params["b2"])

    out = out[:N, :D]
    return out.reshape(orig_shape)


def reference_forward(x, w1, b1, w2, b2):
    h = jnp.maximum(x @ w1 + b1, 0.0)
    return h @ w2 + b2


if __name__ == "__main__":
    # Small shapes consistent with the module: batch=2, seq=8,
    # d_model=32, d_ff=128.
    B, S, D, F = 2, 8, 32, 128

    key = jax.random.PRNGKey(0)
    k_x, k_w1, k_b1, k_w2, k_b2, k_x2 = jax.random.split(key, 6)

    x = jax.random.normal(k_x, (B, S, D), dtype=jnp.float32)
    # PyTorch nn.Linear-style uniform init bounds.
    w1 = jax.random.uniform(k_w1, (D, F), jnp.float32, -1.0 / D**0.5, 1.0 / D**0.5)
    b1 = jax.random.uniform(k_b1, (F,), jnp.float32, -1.0 / D**0.5, 1.0 / D**0.5)
    w2 = jax.random.uniform(k_w2, (F, D), jnp.float32, -1.0 / F**0.5, 1.0 / F**0.5)
    b2 = jax.random.uniform(k_b2, (D,), jnp.float32, -1.0 / F**0.5, 1.0 / F**0.5)

    # One-time parameter prep (pad + bf16 cast); reused across forwards.
    params = prepare_ffn_params(w1, b1, w2, b2)

    out = positionwise_ffn(x.astype(jnp.bfloat16), params)
    out = jax.block_until_ready(out)
    ref = reference_forward(x, w1, b1, w2, b2)
    assert out.shape == (B, S, D)
    # bf16 activations/weights vs f32 reference: allow a small abs tolerance.
    err = jnp.max(jnp.abs(out.astype(jnp.float32) - ref))
    assert err < 1.5e-1, f"mismatch vs reference: {err}"

    # Second run with a row count not divisible by the tile (exercises padding).
    x_odd = jax.random.normal(k_x2, (2, 7, D), dtype=jnp.float32)
    out_odd = jax.block_until_ready(
        positionwise_ffn(x_odd.astype(jnp.bfloat16), params))
    ref_odd = reference_forward(x_odd, w1, b1, w2, b2)
    assert out_odd.shape == (2, 7, D)
    err_odd = jnp.max(jnp.abs(out_odd.astype(jnp.float32) - ref_odd))
    assert err_odd < 1.5e-1, f"mismatch vs reference (padded): {err_odd}"

    print("KERNEL_OK")
</pallas_src>

<mosaic_0001>
module attributes {stable_mosaic.version = 11 : i64} {
  func.func @_ffn_kernel(%arg0: i32, %arg1: i32, %arg2: memref<16x128xbf16, #tpu.memory_space<vmem>>, %arg3: memref<128x128xbf16, #tpu.memory_space<vmem>>, %arg4: memref<1x128xf32, #tpu.memory_space<vmem>>, %arg5: memref<128x128xbf16, #tpu.memory_space<vmem>>, %arg6: memref<1x128xf32, #tpu.memory_space<vmem>>, %arg7: memref<16x128xbf16, #tpu.memory_space<vmem>>, %arg8: memref<16x128xf32, #tpu.memory_space<vmem>>) attributes {dimension_semantics = [#tpu.dimension_semantics<parallel>, #tpu.dimension_semantics<arbitrary>], iteration_bounds = array<i64: 1, 1>, scalar_prefetch = 0 : i64, scratch_operands = 1 : i64, tpu.core_type = #tpu.core_type<tc>, window_params = [{transform_indices = @transform_0, window_bounds = array<i64: 16, 128>}, {transform_indices = @transform_1, window_bounds = array<i64: 128, 128>}, {transform_indices = @transform_2, window_bounds = array<i64: 1, 128>}, {transform_indices = @transform_3, window_bounds = array<i64: 128, 128>}, {pipeline_mode = #tpu.pipeline_mode<synchronous>, transform_indices = @transform_4, window_bounds = array<i64: 1, 128>}, {transform_indices = @transform_5, window_bounds = array<i64: 16, 128>}]} {
    %c0_i32 = arith.constant 0 : i32
    %0 = arith.cmpi eq, %arg1, %c0_i32 : i32
    %1 = arith.extui %0 : i1 to i32
    %c0_i32_0 = arith.constant 0 : i32
    %2 = arith.cmpi ne, %1, %c0_i32_0 : i32
    scf.if %2 {
      %cst_16 = arith.constant 0.000000e+00 : f32
      %20 = vector.broadcast %cst_16 : f32 to vector<16x128xf32>
      %c0_17 = arith.constant 0 : index
      %c0_18 = arith.constant 0 : index
      %21 = vector.load %arg8[%c0_17, %c0_18] : memref<16x128xf32, #tpu.memory_space<vmem>>, vector<16x128xf32>
      tpu.vector_store %arg8[%c0_17, %c0_18], %20 {strides = array<i32>} : memref<16x128xf32, #tpu.memory_space<vmem>>, vector<16x128xf32>,
    } else {
    }
    %c0 = arith.constant 0 : index
    %c0_1 = arith.constant 0 : index
    %3 = vector.load %arg2[%c0, %c0_1] : memref<16x128xbf16, #tpu.memory_space<vmem>>, vector<16x128xbf16>
    %c0_2 = arith.constant 0 : index
    %c0_3 = arith.constant 0 : index
    %4 = vector.load %arg3[%c0_2, %c0_3] : memref<128x128xbf16, #tpu.memory_space<vmem>>, vector<128x128xbf16>
    %cst = arith.constant dense<0.000000e+00> : vector<16x128xf32>
    %5 = tpu.matmul %3, %4, %cst {dimension_numbers = #tpu.dot_dimension_numbers<[1], [0], [0], [1], [0, 0, 1, 1], [], []>} : vector<16x128xbf16>, vector<128x128xbf16>, vector<16x128xf32> -> vector<16x128xf32>
    %c0_4 = arith.constant 0 : index
    %c0_5 = arith.constant 0 : index
    %6 = vector.load %arg4[%c0_4, %c0_5] : memref<1x128xf32, #tpu.memory_space<vmem>>, vector<1x128xf32>
    %7 = vector.broadcast %6 : vector<1x128xf32> to vector<16x128xf32>
    %8 = arith.addf %5, %7 : vector<16x128xf32>
    %cst_6 = arith.constant 0.000000e+00 : f32
    %9 = vector.broadcast %cst_6 : f32 to vector<16x128xf32>
    %10 = arith.maximumf %8, %9 : vector<16x128xf32>
    %c0_7 = arith.constant 0 : index
    %c0_8 = arith.constant 0 : index
    %11 = vector.load %arg8[%c0_7, %c0_8] : memref<16x128xf32, #tpu.memory_space<vmem>>, vector<16x128xf32>
    %12 = arith.truncf %10 : vector<16x128xf32> to vector<16x128xbf16>
    %c0_9 = arith.constant 0 : index
    %c0_10 = arith.constant 0 : index
    %13 = vector.load %arg5[%c0_9, %c0_10] : memref<128x128xbf16, #tpu.memory_space<vmem>>, vector<128x128xbf16>
    %cst_11 = arith.constant dense<0.000000e+00> : vector<16x128xf32>
    %14 = tpu.matmul %12, %13, %cst_11 {dimension_numbers = #tpu.dot_dimension_numbers<[1], [0], [0], [1], [0, 0, 1, 1], [], []>} : vector<16x128xbf16>, vector<128x128xbf16>, vector<16x128xf32> -> vector<16x128xf32>
    %15 = arith.addf %11, %14 : vector<16x128xf32>
    %c0_12 = arith.constant 0 : index
    %c0_13 = arith.constant 0 : index
    %16 = vector.load %arg8[%c0_12, %c0_13] : memref<16x128xf32, #tpu.memory_space<vmem>>, vector<16x128xf32>
    tpu.vector_store %arg8[%c0_12, %c0_13], %15 {strides = array<i32>} : memref<16x128xf32, #tpu.memory_space<vmem>>, vector<16x128xf32>,
    %c0_i32_14 = arith.constant 0 : i32
    %17 = arith.cmpi eq, %arg1, %c0_i32_14 : i32
    %18 = arith.extui %17 : i1 to i32
    %c0_i32_15 = arith.constant 0 : i32
    %19 = arith.cmpi ne, %18, %c0_i32_15 : i32
    scf.if %19 {
      %c0_16 = arith.constant 0 : index
      %c0_17 = arith.constant 0 : index
      %20 = vector.load %arg8[%c0_16, %c0_17] : memref<16x128xf32, #tpu.memory_space<vmem>>, vector<16x128xf32>
      %c0_18 = arith.constant 0 : index
      %c0_19 = arith.constant 0 : index
      %21 = vector.load %arg6[%c0_18, %c0_19] : memref<1x128xf32, #tpu.memory_space<vmem>>, vector<1x128xf32>
      %22 = vector.broadcast %21 : vector<1x128xf32> to vector<16x128xf32>
      %23 = arith.addf %20, %22 : vector<16x128xf32>
      %24 = arith.truncf %23 : vector<16x128xf32> to vector<16x128xbf16>
      %c0_20 = arith.constant 0 : index
      %c0_21 = arith.constant 0 : index
      %25 = vector.load %arg7[%c0_20, %c0_21] : memref<16x128xbf16, #tpu.memory_space<vmem>>, vector<16x128xbf16>
      tpu.vector_store %arg7[%c0_20, %c0_21], %24 {strides = array<i32>} : memref<16x128xbf16, #tpu.memory_space<vmem>>, vector<16x128xbf16>,
    } else {
    }
    return
  }
  func.func @transform_0(%arg0: i32, %arg1: i32) -> (i32, i32) {
    %c0_i32 = arith.constant 0 : i32
    %c0_i32_0 = arith.constant 0 : i32
    return %arg0, %c0_i32 : i32, i32
  }
  func.func @transform_1(%arg0: i32, %arg1: i32) -> (i32, i32) {
    %c0_i32 = arith.constant 0 : i32
    %c0_i32_0 = arith.constant 0 : i32
    return %c0_i32, %arg1 : i32, i32
  }
  func.func @transform_2(%arg0: i32, %arg1: i32) -> (i32, i32) {
    %c0_i32 = arith.constant 0 : i32
    %c0_i32_0 = arith.constant 0 : i32
    return %c0_i32, %arg1 : i32, i32
  }
  func.func @transform_3(%arg0: i32, %arg1: i32) -> (i32, i32) {
    %c0_i32 = arith.constant 0 : i32
    %c0_i32_0 = arith.constant 0 : i32
    return %arg1, %c0_i32 : i32, i32
  }
  func.func @transform_4(%arg0: i32, %arg1: i32) -> (i32, i32) {
    %c0_i32 = arith.constant 0 : i32
    %c0_i32_0 = arith.constant 0 : i32
    %c0_i32_1 = arith.constant 0 : i32
    return %c0_i32, %c0_i32_0 : i32, i32
  }
  func.func @transform_5(%arg0: i32, %arg1: i32) -> (i32, i32) {
    %c0_i32 = arith.constant 0 : i32
    %c0_i32_0 = arith.constant 0 : i32
    return %arg0, %c0_i32 : i32, i32
  }
}

</mosaic_0001>

<bundles_post_ra>
// kernel: tpu_custom_call.1
= control target key start
LH: loop header
LB: loop body
LE: loop exit
PB: predicated region body
PF: predicated region fallthrough
CT: control target
= control target key end

     0   :  { %10 = vsyncpa [#allocation4], 0  ;;  %s661_s0 = inlined_call_operand.hbm [shape: bf16[16,128], index: 0, kind: input, shape index: {}]   ;;  %s662_s1 = inlined_call_operand.hbm [shape: bf16[128,128], index: 1, kind: input, shape index: {}]   ;;  %s663_s2 = inlined_call_operand.vmem [shape: f32[1,128], index: 2, kind: input, shape index: {}]   ;;  %s664_s3 = inlined_call_operand.hbm [shape: bf16[128,128], index: 3, kind: input, shape index: {}]   ;;  %s665_s4 = inlined_call_operand.vmem [shape: f32[1,128], index: 4, kind: input, shape index: {}]   ;;  %s666_s5 = inlined_call_operand.hbm [shape: bf16[16,128], index: 5, kind: output, shape index: {}]  }
   0x1   :  { %11 = vsyncpa [#allocation7], 0 }
   0x2   :  { %12 = vsyncpa [#allocation5], 0  ;;  %s550_s18 = smov [#allocation6]   ;;  %s551_s20 = smov [#allocation3]  }
   0x3   :  { %s30_s19 = sshll.u32 %s550_s18, 4  ;;  %s18_s21 = sshll.u32 %s551_s20, 4  ;;  %s31_s19 = int_to_ptr.vmem [resolvable:$true] %s30_s19  ;;  %s588_s21 = int_to_ptr.vmem [resolvable:$true] %s18_s21 }
   0x4   :  { %s456_s24 = scalar_lea.hbm %s662_s1, 1024 }
   0x5   :  { %p457_p0 = scmp.ne.s32.totalorder %s662_s1, %s456_s24  ;;  %p460_p1 = scmp.lt.u32.totalorder %s456_s24, %s662_s1 }
   0x7   :  { %p462_p2 = pnand %p460_p1, %p457_p0 }
   0x9   :  { %465 = shalt.err (!%p462_p2)
}
   0xa   :  { %s466_s29 = scalar_lea.vmem %s31_s19, 1024  ;;  %p471_p4 = scmp.lt.s32.totalorder %s31_s19, %s31_s19 }
   0xb   :  { %p467_p3 = scmp.ne.s32.totalorder %s31_s19, %s466_s29  ;;  %p472_p5 = scmp.lt.s32.totalorder %s466_s29, %s466_s29 }
   0xd   :  { %p473_p6 = por %p472_p5, %p471_p4 }
   0xf   :  { %p474_p7 = pnand %p473_p6, %p467_p3 }
  0x11   :  { %477 = shalt.err (!%p474_p7)
}
  0x12   :  { %s552_s30 = smov 64   ;;  %s553_s6 = smov 4  }
  0x13   :  { %36 = dma.hbm_to_vmem [thread:$0]  %s662_s1, 1024, %s31_s19, [#allocation7], %s552_s30, %s552_s30, %s553_s6  }
  0x14   :  { %s478_s11 = scalar_lea.hbm %s661_s0, 128 }
  0x15   :  { %p479_p8 = scmp.ne.s32.totalorder %s661_s0, %s478_s11  ;;  %p482_p9 = scmp.lt.u32.totalorder %s478_s11, %s661_s0 }
  0x17   :  { %p484_p10 = pnand %p482_p9, %p479_p8 }
  0x19   :  { %487 = shalt.err (!%p484_p10)
}
  0x1a   :  { %s488_s16 = scalar_lea.vmem %s588_s21, 128  ;;  %p493_p12 = scmp.lt.s32.totalorder %s588_s21, %s588_s21 }
  0x1b   :  { %p489_p11 = scmp.ne.s32.totalorder %s588_s21, %s488_s16  ;;  %p494_p13 = scmp.lt.s32.totalorder %s488_s16, %s488_s16 }
  0x1d   :  { %p495_p0 = por %p494_p13, %p493_p12 }
  0x1f   :  { %p496_p1 = pnand %p495_p0, %p489_p11 }
  0x21   :  { %499 = shalt.err (!%p496_p1)
}
  0x22   :  { %24 = dma.hbm_to_vmem [thread:$0]  %s661_s0, 128, %s588_s21, [#allocation4], %s552_s30, %s552_s30, %s553_s6  }
  0x23   :  { %s554_s18 = smov [#allocation8]   ;;  %s500_s23 = scalar_lea.hbm %s664_s3, 1024 }
  0x24   :  { %s44_s19 = sshll.u32 %s554_s18, 4  ;;  %p501_p2 = scmp.ne.s32.totalorder %s664_s3, %s500_s23  ;;  %s45_s19 = int_to_ptr.vmem [resolvable:$true] %s44_s19 }
  0x25   :  { %p504_p3 = scmp.lt.u32.totalorder %s500_s23, %s664_s3 }
  0x27   :  { %p506_p4 = pnand %p504_p3, %p501_p2 }
  0x29   :  { %509 = shalt.err (!%p506_p4)
}
  0x2a   :  { %s510_s28 = scalar_lea.vmem %s45_s19, 1024  ;;  %p515_p6 = scmp.lt.s32.totalorder %s45_s19, %s45_s19 }
  0x2b   :  { %p511_p5 = scmp.ne.s32.totalorder %s45_s19, %s510_s28  ;;  %p516_p7 = scmp.lt.s32.totalorder %s510_s28, %s510_s28 }
  0x2d   :  { %p517_p8 = por %p516_p7, %p515_p6 }
  0x2f   :  { %p518_p9 = pnand %p517_p8, %p511_p5 }
  0x31   :  { %521 = shalt.err (!%p518_p9)
}
  0x32   :  { %50 = dma.hbm_to_vmem [thread:$0]  %s664_s3, 1024, %s45_s19, [#allocation7], %s552_s30, %s552_s30, %s553_s6  }
  0x33   :  { %544 = dma.done.wait [#allocation4], 128  }
  0x34   :  { %545 = vsyncadd [#allocation4], 4294967168 }
  0x35   :  { %546 = dma.done.wait [#allocation7], 2048  }
  0x36   :  { %547 = vsyncadd [#allocation7], 4294965248  ;;  %v555_v0 = vmov 0.0   ;;  %vm556_vm0 = vmmov 0   ;;  %v439_v1 = vld [vmem:[#allocation6] sm:$0xff]   ;;  %v440_v2 = vld [vmem:[#allocation6 + $0x8] sm:$0xff]  }
  0x37   :  { %391 = vmatprep.subr.bf16.mxu0 %v555_v0  ;;  %407 = vmatprep.mubr.msk.bf16.mxu0 %vm556_vm0, %v555_v0  ;;  %v441_v3 = vld [vmem:[#allocation6 + $0x10] sm:$0xff]   ;;  %v448_v4 = vld [vmem:[#allocation8] sm:$0xff]   ;;  %v442_v5 = vld [vmem:[#allocation6 + $0x18] sm:$0xff]   ;;  %s557_s9 = smov [#allocation9]  }
  0x38   :  { %411 = vmatprep.subr.bf16.mxu1 %v555_v0  ;;  %427 = vmatprep.mubr.msk.bf16.mxu1 %vm556_vm0, %v555_v0  ;;  %v449_v6 = vld [vmem:[#allocation8 + $0x8] sm:$0xff]   ;;  %v443_v7 = vld [vmem:[#allocation6 + $0x20] sm:$0xff]   ;;  %v450_v8 = vld [vmem:[#allocation8 + $0x10] sm:$0xff]   ;;  %s332_s10 = sshll.u32 %s557_s9, 4  ;;  %s333_s10 = int_to_ptr.vmem [resolvable:$true] %s332_s10 }
  0x39   :  { %392 = vmatpush3.bf16.msra.mxu0 %v439_v1  ;;  %412 = vmatpush3.bf16.msra.mxu1 %v448_v4  ;;  %v444_v9 = vld [vmem:[#allocation6 + $0x28] sm:$0xff]   ;;  %v451_v10 = vld [vmem:[#allocation8 + $0x18] sm:$0xff]   ;;  %v445_v11 = vld [vmem:[#allocation6 + $0x30] sm:$0xff]   ;;  %p527_p11 = scmp.lt.s32.totalorder %s333_s10, %s333_s10 }
  0x3a   :  { %393 = vmatprep.subr.bf16.mxu0 %v555_v0  ;;  %413 = vmatprep.subr.bf16.mxu1 %v555_v0  ;;  %v452_v12 = vld [vmem:[#allocation8 + $0x20] sm:$0xff]   ;;  %v446_v13 = vld [vmem:[#allocation6 + $0x38] sm:$0xff]   ;;  %v453_v14 = vld [vmem:[#allocation8 + $0x28] sm:$0xff]  }
  0x3b   :  { %v447_v15 = vld [vmem:[#allocation3] sm:$0xff]   ;;  %v454_v16 = vld [vmem:[#allocation8 + $0x30] sm:$0xff]  }
  0x3c   :  { %v455_v17 = vld [vmem:[#allocation8 + $0x38] sm:$0xff]  }
  0x3d   :  { %394 = vmatpush3.bf16.msra.mxu0 %v440_v2  ;;  %414 = vmatpush3.bf16.msra.mxu1 %v449_v6  ;;  %v345_v18 = vld [vmem:[%s663_s2] ss:$0 sm:$0xff]  ;;  %s522_s2 = scalar_lea.vmem %s333_s10, 128 }
  0x3e   :  { %395 = vmatprep.subr.bf16.mxu0 %v555_v0  ;;  %415 = vmatprep.subr.bf16.mxu1 %v555_v0  ;;  %v363_v29 = vld [vmem:[%s665_s4] ss:$0 sm:$0xff]  ;;  %p523_p10 = scmp.ne.s32.totalorder %s333_s10, %s522_s2  ;;  %p528_p12 = scmp.lt.s32.totalorder %s522_s2, %s522_s2 }
  0x40   :  { %p529_p13 = por %p528_p12, %p527_p11 }
  0x41   :  { %396 = vmatpush3.bf16.msra.mxu0 %v441_v3  ;;  %416 = vmatpush3.bf16.msra.mxu1 %v450_v8 }
  0x42   :  { %397 = vmatprep.subr.bf16.mxu0 %v555_v0  ;;  %417 = vmatprep.subr.bf16.mxu1 %v555_v0  ;;  %p530_p0 = pnand %p529_p13, %p523_p10 }
  0x45   :  { %398 = vmatpush3.bf16.msra.mxu0 %v442_v5  ;;  %418 = vmatpush3.bf16.msra.mxu1 %v451_v10 }
  0x46   :  { %399 = vmatprep.subr.bf16.mxu0 %v555_v0  ;;  %419 = vmatprep.subr.bf16.mxu1 %v555_v0 }
  0x49   :  { %400 = vmatpush3.bf16.msra.mxu0 %v443_v7  ;;  %420 = vmatpush3.bf16.msra.mxu1 %v452_v12 }
  0x4a   :  { %401 = vmatprep.subr.bf16.mxu0 %v555_v0  ;;  %421 = vmatprep.subr.bf16.mxu1 %v555_v0 }
  0x4d   :  { %402 = vmatpush3.bf16.msra.mxu0 %v444_v9  ;;  %422 = vmatpush3.bf16.msra.mxu1 %v453_v14 }
  0x4e   :  { %403 = vmatprep.subr.bf16.mxu0 %v555_v0  ;;  %423 = vmatprep.subr.bf16.mxu1 %v555_v0 }
  0x51   :  { %404 = vmatpush3.bf16.msra.mxu0 %v445_v11  ;;  %424 = vmatpush3.bf16.msra.mxu1 %v454_v16 }
  0x52   :  { %405 = vmatprep.subr.bf16.mxu0 %v555_v0  ;;  %425 = vmatprep.subr.bf16.mxu1 %v555_v0 }
  0x55   :  { %406 = vmatpush3.bf16.msra.mxu0 %v446_v13  ;;  %426 = vmatpush3.bf16.msra.mxu1 %v455_v17 }
  0x58   :  { %408 = vmatmul.mubr.bf16.vlgmr.msra.gmra.mrb[0].mxu0 %v447_v15 }
 0x12b   :  { %v182_v19 = vpop.f32.mrb[0].mxu0 }
 0x12c   :  { %v183_v20 = vadd.f32 %v345_v18, %v182_v19  ;;  %v409_v21 = vpop.f32.mrb[1].mxu0 }
 0x12d   :  { %v185_v22 = vpop.f32.mrb[2].mxu0 }
 0x12e   :  { %v186_v23 = vadd.f32 %v345_v18, %v185_v22  ;;  %v410_v24 = vpop.f32.mrb[3].mxu0  ;;  %v189_v25 = vmax.f32 %v183_v20, 0.0 }
 0x130   :  { %v190_v26 = vmax.f32 %v186_v23, 0.0 }
 0x132   :  { %v193_v27 = vpack.c.bf16 %v190_v26, %v189_v25 }
 0x134   :  { %428 = vmatmul.mubr.bf16.vlgmr.msra.gmra.mrb[0].mxu1 %v193_v27 }
 0x207   :  { %v292_v28 = vpop.f32.mrb[0].mxu1 }
 0x208   :  { %v429_v30 = vpop.f32.mrb[1].mxu1  ;;  %v315_v32 = vadd.f32 %v363_v29, %v292_v28 }
 0x209   :  { %v295_v31 = vpop.f32.mrb[2].mxu1 }
 0x20a   :  { %v316_v33 = vadd.f32 %v363_v29, %v295_v31  ;;  %v430_v34 = vpop.f32.mrb[3].mxu1 }
 0x20c   :  { %v371_v35 = vpack.c.bf16 %v316_v33, %v315_v32 }
 0x20e   :  { %372 = vst [vmem:[#allocation9] sm:$0xff] %v371_v35  }
 0x20f   :  { %533 = shalt.err (!%p530_p0)
}
 0x210   :  { %s534_s4 = scalar_lea.hbm %s666_s5, 128 }
 0x211   :  { %p535_p1 = scmp.ne.s32.totalorder %s666_s5, %s534_s4  ;;  %p538_p2 = scmp.lt.u32.totalorder %s534_s4, %s666_s5 }
 0x213   :  { %p540_p3 = pnand %p538_p2, %p535_p1 }
 0x215   :  { %543 = shalt.err (!%p540_p3)
}
 0x216   :  { %338 = dma.vmem_to_hbm [thread:$0]  %s333_s10, 128, %s666_s5, [#allocation5], %s552_s30, %s552_s30, %s553_s6  }
 0x217   :  { %548 = dma.done.wait [#allocation5], 128  }
 0x218   :  { %549 = vsyncadd [#allocation5], 4294967168 }
 0x219   :  { %342 = vsyncpa [#allocation4], 1 }
 0x21a   :  { %343 = vsyncpa [#allocation7], 1 }
 0x21b   :  { %344 = vsyncpa [#allocation5], 1 }

</bundles_post_ra>
